<compile_context>
chip_gen: v6e
topology: v6e:2x2x1
jax: 0.10.0
libtpu: 0.0.40
codegen_flags: <defaults>
</compile_context>

<pallas_src>
import functools

import jax
import jax.numpy as jnp
from jax.experimental import pallas as pl
from jax.experimental.pallas import tpu as pltpu

INPUT_SIZE = 24
_LANE = 128
_SUBLANE = 8
_MAX_TB = 1024            # largest batch tile; fits VMEM on v5e/v6e/v7x
_MIB = 1024 * 1024


def _round_up(x, m):
    return ((x + m - 1) // m) * m


# ---------------------------------------------------------------------------
# Fused MLP kernel
# ---------------------------------------------------------------------------
def _mlp_kernel(*refs, n_hidden):
    """relu(x @ W1 + b1) -> n_hidden x relu(h @ Wi + bi) -> sum(h * wo_row) + bo.

    Hidden feature dims are pre-padded to 128 lanes; the activation `h` stays
    resident in vregs/VMEM across the statically unrolled layer loop.  The
    final H->1 layer is a VPU multiply + XLU cross-lane reduce (MXU-free) and
    produces a compact (tb, 1) result.
    """
    if n_hidden > 0:
        x_ref, w1_ref, b1_ref, wh_ref, bh_ref, wo_ref, bo_ref, o_ref = refs
    else:
        x_ref, w1_ref, b1_ref, wo_ref, bo_ref, o_ref = refs

    h = jnp.dot(x_ref[...], w1_ref[...], preferred_element_type=jnp.float32)
    h = jnp.maximum(h + b1_ref[...], 0.0)

    for i in range(n_hidden):  # statically unrolled; weights already in VMEM
        h = jnp.dot(h, wh_ref[i], preferred_element_type=jnp.float32)
        h = jnp.maximum(h + bh_ref[i], 0.0)

    # Final Linear(H -> 1) off the MXU: elementwise mul + cross-lane reduce.
    y = jnp.sum(h * wo_ref[...], axis=-1, keepdims=True) + bo_ref[0]
    o_ref[...] = y.astype(o_ref.dtype)


# ---------------------------------------------------------------------------
# Parameter init (mimics torch.nn.Linear default) and one-time packing
# ---------------------------------------------------------------------------
def init_linear_params(key, in_features, out_features):
    k_w, k_b = jax.random.split(key)
    bound = 1.0 / jnp.sqrt(jnp.float32(in_features))
    # PyTorch stores weight as (out, in); keep that convention for raw params.
    w = jax.random.uniform(k_w, (out_features, in_features), jnp.float32,
                           minval=-bound, maxval=bound)
    b = jax.random.uniform(k_b, (out_features,), jnp.float32,
                           minval=-bound, maxval=bound)
    return w, b


def init_my_ann_params(key, hidden_size, num_layers):
    keys = jax.random.split(key, num_layers + 1)
    return {
        "hidden1": init_linear_params(keys[0], INPUT_SIZE, hidden_size),
        "hidden": [init_linear_params(keys[1 + i], hidden_size, hidden_size)
                   for i in range(num_layers - 1)],
        "out": init_linear_params(keys[num_layers], hidden_size, 1),
    }


def pack_my_ann_params(params, hidden_size, num_layers):
    """One-time packing outside the forward hot path:
      * weights pre-transposed to (in, out)
      * hidden feature dims zero-padded to 128 lanes
      * hidden layers stacked into one (n_hidden, h_pad, h_pad) tensor
      * output layer kept as a (1, h_pad) row + scalar bias (VPU/XLU path)
      * the 24-wide input dim is NOT padded (full-extent last-dim block)."""
    h_pad = _round_up(hidden_size, _LANE)
    n_hidden = num_layers - 1

    w1, b1 = params["hidden1"]
    w1_p = jnp.zeros((INPUT_SIZE, h_pad), jnp.float32)
    w1_p = w1_p.at[:, :hidden_size].set(w1.T)
    b1_p = jnp.zeros((1, h_pad), jnp.float32).at[0, :hidden_size].set(b1)

    if n_hidden > 0:
        wh_p = jnp.zeros((n_hidden, h_pad, h_pad), jnp.float32)
        bh_p = jnp.zeros((n_hidden, 1, h_pad), jnp.float32)
        for i, (w, b) in enumerate(params["hidden"]):
            wh_p = wh_p.at[i, :hidden_size, :hidden_size].set(w.T)
            bh_p = bh_p.at[i, 0, :hidden_size].set(b)
    else:
        wh_p, bh_p = None, None

    w_out, b_out = params["out"]                     # (1, hidden_size), (1,)
    wo_p = jnp.zeros((1, h_pad), jnp.float32).at[0, :hidden_size].set(w_out[0])
    bo_p = b_out.astype(jnp.float32)                 # (1,), lives in SMEM

    return {
        "n_hidden": n_hidden, "h_pad": h_pad, "hidden_size": hidden_size,
        "w1": w1_p, "b1": b1_p, "wh": wh_p, "bh": bh_p,
        "wo": wo_p, "bo": bo_p,
    }


# ---------------------------------------------------------------------------
# Tiling / VMEM sizing helpers
# ---------------------------------------------------------------------------
def _pick_batch_tile(B):
    """Large tiles amortize the ~0.35us/step pipeline overhead; for big batches
    keep the grid >= 2 steps so v7x can shard the 'parallel' axis over 2 TCs."""
    if B <= 256:
        return _round_up(B, _SUBLANE)                 # single sublane-aligned tile
    tb = _round_up(pl.cdiv(B, 2), _LANE)              # >= 2 grid steps
    return min(tb, _MAX_TB)


def _vmem_bytes_estimate(tb, h_pad, n_hidden):
    f32 = 4
    io_tiles = 2 * (tb * INPUT_SIZE + tb * 1) * f32   # double-buffered x / out tiles
    weights = (INPUT_SIZE * h_pad + h_pad              # w1, b1
               + n_hidden * (h_pad * h_pad + h_pad)    # stacked wh, bh
               + h_pad) * f32                          # wo row
    return io_tiles + 2 * weights                      # const blocks still double-buffered


# ---------------------------------------------------------------------------
# Forward pass (single pallas_call over a batch-tiled 'parallel' grid)
# ---------------------------------------------------------------------------
def my_ann_forward(packed, x):
    B = x.shape[0]
    if B == 0:
        return jnp.zeros((0, 1), jnp.float32)

    h_pad = packed["h_pad"]
    n_hidden = packed["n_hidden"]
    hidden_size = packed["hidden_size"]

    tb = _pick_batch_tile(B)
    b_pad = _round_up(B, tb)
    num_tiles = b_pad // tb

    x_f = x.astype(jnp.float32)
    if b_pad == B:
        x_p = x_f                                      # no pad pass in the common case
    else:
        x_p = jnp.zeros((b_pad, INPUT_SIZE), jnp.float32).at[:B].set(x_f)

    operands = [x_p, packed["w1"], packed["b1"]]
    in_specs = [
        pl.BlockSpec((tb, INPUT_SIZE), lambda i: (i, 0)),     # un-padded 24-wide rows
        pl.BlockSpec((INPUT_SIZE, h_pad), lambda i: (0, 0)),  # weights: resident in VMEM
        pl.BlockSpec((1, h_pad), lambda i: (0, 0)),
    ]
    if n_hidden > 0:
        operands += [packed["wh"], packed["bh"]]
        in_specs += [
            pl.BlockSpec((n_hidden, h_pad, h_pad), lambda i: (0, 0, 0)),
            pl.BlockSpec((n_hidden, 1, h_pad), lambda i: (0, 0, 0)),
        ]
    operands += [packed["wo"], packed["bo"]]
    in_specs += [
        pl.BlockSpec((1, h_pad), lambda i: (0, 0)),
        pl.BlockSpec(memory_space=pltpu.MemorySpace.SMEM),    # scalar output bias
    ]

    # Advisory cost estimate (helps XLA schedule around the custom call).
    flops = 2 * B * (INPUT_SIZE * hidden_size
                     + n_hidden * hidden_size * hidden_size
                     + hidden_size)
    bytes_weights = 4 * (INPUT_SIZE * h_pad + h_pad
                         + n_hidden * (h_pad * h_pad + h_pad) + h_pad + 1)
    cost = pl.CostEstimate(
        flops=flops, transcendentals=0,
        bytes_accessed=4 * (b_pad * INPUT_SIZE + b_pad) + bytes_weights)

    # Only raise the scoped-VMEM limit when the resident weight stack needs it
    # (large hidden_size / num_layers); stay under v7x's 64 MiB physical VMEM.
    vmem_need = _vmem_bytes_estimate(tb, h_pad, n_hidden)
    vmem_limit = None
    if vmem_need > 12 * _MIB:
        vmem_limit = int(min(vmem_need + 4 * _MIB, 60 * _MIB))

    kernel = functools.partial(_mlp_kernel, n_hidden=n_hidden)
    out = pl.pallas_call(
        kernel,
        out_shape=jax.ShapeDtypeStruct((b_pad, 1), jnp.float32),
        grid=(num_tiles,),
        in_specs=in_specs,
        out_specs=pl.BlockSpec((tb, 1), lambda i: (i, 0)),
        compiler_params=pltpu.CompilerParams(
            dimension_semantics=("parallel",),
            vmem_limit_bytes=vmem_limit),
        cost_estimate=cost,
    )(*operands)

    return out[:B]


# ---------------------------------------------------------------------------
# Demo / correctness check
# ---------------------------------------------------------------------------
if __name__ == "__main__":
    HIDDEN_SIZE = 32
    NUM_LAYERS = 3
    BATCH = 8

    key = jax.random.PRNGKey(0)
    k_params, k_x = jax.random.split(key)

    params = init_my_ann_params(k_params, HIDDEN_SIZE, NUM_LAYERS)
    packed = pack_my_ann_params(params, HIDDEN_SIZE, NUM_LAYERS)
    x = jax.random.normal(k_x, (BATCH, INPUT_SIZE), jnp.float32)

    pred = my_ann_forward(packed, x)
    pred = jax.block_until_ready(pred)

    # Pure-JAX reference matching myANN.forward exactly.
    def ref_forward(params, x):
        w1, b1 = params["hidden1"]
        h = jnp.maximum(x @ w1.T + b1, 0.0)
        for (w, b) in params["hidden"]:
            h = jnp.maximum(h @ w.T + b, 0.0)
        w_out, b_out = params["out"]
        return h @ w_out.T + b_out

    ref = ref_forward(params, x)
    assert pred.shape == (BATCH, 1)
    assert jnp.allclose(pred, ref, atol=1e-5, rtol=1e-5)

    print("KERNEL_OK")
</pallas_src>

<mosaic_0001>
module attributes {stable_mosaic.version = 11 : i64} {
  func.func @_mlp_kernel(%arg0: i32, %arg1: memref<8x24xf32, #tpu.memory_space<vmem>>, %arg2: memref<24x128xf32, #tpu.memory_space<vmem>>, %arg3: memref<1x128xf32, #tpu.memory_space<vmem>>, %arg4: memref<2x128x128xf32, #tpu.memory_space<vmem>>, %arg5: memref<2x1x128xf32, #tpu.memory_space<vmem>>, %arg6: memref<1x128xf32, #tpu.memory_space<vmem>>, %arg7: memref<1xf32, #tpu.memory_space<smem>>, %arg8: memref<8x1xf32, #tpu.memory_space<vmem>>) attributes {dimension_semantics = [#tpu.dimension_semantics<parallel>], iteration_bounds = array<i64: 1>, scalar_prefetch = 0 : i64, scratch_operands = 0 : i64, tpu.core_type = #tpu.core_type<tc>, window_params = [{transform_indices = @transform_0, window_bounds = array<i64: 8, 24>}, {pipeline_mode = #tpu.pipeline_mode<synchronous>, transform_indices = @transform_1, window_bounds = array<i64: 24, 128>}, {pipeline_mode = #tpu.pipeline_mode<synchronous>, transform_indices = @transform_2, window_bounds = array<i64: 1, 128>}, {pipeline_mode = #tpu.pipeline_mode<synchronous>, transform_indices = @transform_3, window_bounds = array<i64: 2, 128, 128>}, {pipeline_mode = #tpu.pipeline_mode<synchronous>, transform_indices = @transform_4, window_bounds = array<i64: 2, 1, 128>}, {pipeline_mode = #tpu.pipeline_mode<synchronous>, transform_indices = @transform_5, window_bounds = array<i64: 1, 128>}, {transform_indices = @transform_6, window_bounds = array<i64: 1>}, {transform_indices = @transform_7, window_bounds = array<i64: 8, 1>}]} {
    %c0 = arith.constant 0 : index
    %c0_0 = arith.constant 0 : index
    %0 = vector.load %arg1[%c0, %c0_0] : memref<8x24xf32, #tpu.memory_space<vmem>>, vector<8x24xf32>
    %c0_1 = arith.constant 0 : index
    %c0_2 = arith.constant 0 : index
    %1 = vector.load %arg2[%c0_1, %c0_2] : memref<24x128xf32, #tpu.memory_space<vmem>>, vector<24x128xf32>
    %cst = arith.constant dense<0.000000e+00> : vector<8x128xf32>
    %2 = tpu.matmul %0, %1, %cst {dimension_numbers = #tpu.dot_dimension_numbers<[1], [0], [0], [1], [0, 0, 1, 1], [], []>} : vector<8x24xf32>, vector<24x128xf32>, vector<8x128xf32> -> vector<8x128xf32>
    %c0_3 = arith.constant 0 : index
    %c0_4 = arith.constant 0 : index
    %3 = vector.load %arg3[%c0_3, %c0_4] : memref<1x128xf32, #tpu.memory_space<vmem>>, vector<1x128xf32>
    %4 = vector.broadcast %3 : vector<1x128xf32> to vector<8x128xf32>
    %5 = arith.addf %2, %4 : vector<8x128xf32>
    %cst_5 = arith.constant 0.000000e+00 : f32
    %6 = vector.broadcast %cst_5 : f32 to vector<8x128xf32>
    %7 = arith.maximumf %5, %6 : vector<8x128xf32>
    %c0_6 = arith.constant 0 : index
    %c0_7 = arith.constant 0 : index
    %c0_8 = arith.constant 0 : index
    %8 = vector.load %arg4[%c0_6, %c0_7, %c0_8] : memref<2x128x128xf32, #tpu.memory_space<vmem>>, vector<1x128x128xf32>
    %9 = vector.shape_cast %8 : vector<1x128x128xf32> to vector<128x128xf32>
    %cst_9 = arith.constant dense<0.000000e+00> : vector<8x128xf32>
    %10 = tpu.matmul %7, %9, %cst_9 {dimension_numbers = #tpu.dot_dimension_numbers<[1], [0], [0], [1], [0, 0, 1, 1], [], []>} : vector<8x128xf32>, vector<128x128xf32>, vector<8x128xf32> -> vector<8x128xf32>
    %c0_10 = arith.constant 0 : index
    %c0_11 = arith.constant 0 : index
    %c0_12 = arith.constant 0 : index
    %11 = vector.load %arg5[%c0_10, %c0_11, %c0_12] : memref<2x1x128xf32, #tpu.memory_space<vmem>>, vector<1x1x128xf32>
    %12 = vector.shape_cast %11 : vector<1x1x128xf32> to vector<1x128xf32>
    %13 = vector.broadcast %12 : vector<1x128xf32> to vector<8x128xf32>
    %14 = arith.addf %10, %13 : vector<8x128xf32>
    %cst_13 = arith.constant 0.000000e+00 : f32
    %15 = vector.broadcast %cst_13 : f32 to vector<8x128xf32>
    %16 = arith.maximumf %14, %15 : vector<8x128xf32>
    %c1 = arith.constant 1 : index
    %c0_14 = arith.constant 0 : index
    %c0_15 = arith.constant 0 : index
    %17 = vector.load %arg4[%c1, %c0_14, %c0_15] : memref<2x128x128xf32, #tpu.memory_space<vmem>>, vector<1x128x128xf32>
    %18 = vector.shape_cast %17 : vector<1x128x128xf32> to vector<128x128xf32>
    %cst_16 = arith.constant dense<0.000000e+00> : vector<8x128xf32>
    %19 = tpu.matmul %16, %18, %cst_16 {dimension_numbers = #tpu.dot_dimension_numbers<[1], [0], [0], [1], [0, 0, 1, 1], [], []>} : vector<8x128xf32>, vector<128x128xf32>, vector<8x128xf32> -> vector<8x128xf32>
    %c1_17 = arith.constant 1 : index
    %c0_18 = arith.constant 0 : index
    %c0_19 = arith.constant 0 : index
    %20 = vector.load %arg5[%c1_17, %c0_18, %c0_19] : memref<2x1x128xf32, #tpu.memory_space<vmem>>, vector<1x1x128xf32>
    %21 = vector.shape_cast %20 : vector<1x1x128xf32> to vector<1x128xf32>
    %22 = vector.broadcast %21 : vector<1x128xf32> to vector<8x128xf32>
    %23 = arith.addf %19, %22 : vector<8x128xf32>
    %cst_20 = arith.constant 0.000000e+00 : f32
    %24 = vector.broadcast %cst_20 : f32 to vector<8x128xf32>
    %25 = arith.maximumf %23, %24 : vector<8x128xf32>
    %c0_21 = arith.constant 0 : index
    %c0_22 = arith.constant 0 : index
    %26 = vector.load %arg6[%c0_21, %c0_22] : memref<1x128xf32, #tpu.memory_space<vmem>>, vector<1x128xf32>
    %27 = vector.broadcast %26 : vector<1x128xf32> to vector<8x128xf32>
    %28 = arith.mulf %25, %27 : vector<8x128xf32>
    %cst_23 = arith.constant dense<0.000000e+00> : vector<8xf32>
    %29 = vector.multi_reduction <add>, %28, %cst_23 [1] : vector<8x128xf32> to vector<8xf32>
    %30 = vector.shape_cast %29 : vector<8xf32> to vector<8x1xf32>
    %c0_24 = arith.constant 0 : index
    %31 = memref.load %arg7[%c0_24] : memref<1xf32, #tpu.memory_space<smem>>
    %32 = vector.broadcast %31 : f32 to vector<8x1xf32>
    %33 = arith.addf %30, %32 : vector<8x1xf32>
    %c0_25 = arith.constant 0 : index
    %c0_26 = arith.constant 0 : index
    %34 = vector.load %arg8[%c0_25, %c0_26] : memref<8x1xf32, #tpu.memory_space<vmem>>, vector<8x1xf32>
    tpu.vector_store %arg8[%c0_25, %c0_26], %33 {strides = array<i32>} : memref<8x1xf32, #tpu.memory_space<vmem>>, vector<8x1xf32>,
    return
  }
  func.func @transform_0(%arg0: i32) -> (i32, i32) {
    %c0_i32 = arith.constant 0 : i32
    %c0_i32_0 = arith.constant 0 : i32
    return %arg0, %c0_i32 : i32, i32
  }
  func.func @transform_1(%arg0: i32) -> (i32, i32) {
    %c0_i32 = arith.constant 0 : i32
    %c0_i32_0 = arith.constant 0 : i32
    %c0_i32_1 = arith.constant 0 : i32
    return %c0_i32, %c0_i32_0 : i32, i32
  }
  func.func @transform_2(%arg0: i32) -> (i32, i32) {
    %c0_i32 = arith.constant 0 : i32
    %c0_i32_0 = arith.constant 0 : i32
    %c0_i32_1 = arith.constant 0 : i32
    return %c0_i32, %c0_i32_0 : i32, i32
  }
  func.func @transform_3(%arg0: i32) -> (i32, i32, i32) {
    %c0_i32 = arith.constant 0 : i32
    %c0_i32_0 = arith.constant 0 : i32
    %c0_i32_1 = arith.constant 0 : i32
    %c0_i32_2 = arith.constant 0 : i32
    return %c0_i32, %c0_i32_0, %c0_i32_1 : i32, i32, i32
  }
  func.func @transform_4(%arg0: i32) -> (i32, i32, i32) {
    %c0_i32 = arith.constant 0 : i32
    %c0_i32_0 = arith.constant 0 : i32
    %c0_i32_1 = arith.constant 0 : i32
    %c0_i32_2 = arith.constant 0 : i32
    return %c0_i32, %c0_i32_0, %c0_i32_1 : i32, i32, i32
  }
  func.func @transform_5(%arg0: i32) -> (i32, i32) {
    %c0_i32 = arith.constant 0 : i32
    %c0_i32_0 = arith.constant 0 : i32
    %c0_i32_1 = arith.constant 0 : i32
    return %c0_i32, %c0_i32_0 : i32, i32
  }
  func.func @transform_6(%arg0: i32) -> i32 {
    %c0_i32 = arith.constant 0 : i32
    %c0_i32_0 = arith.constant 0 : i32
    return %c0_i32 : i32
  }
  func.func @transform_7(%arg0: i32) -> (i32, i32) {
    %c0_i32 = arith.constant 0 : i32
    %c0_i32_0 = arith.constant 0 : i32
    return %arg0, %c0_i32 : i32, i32
  }
}

</mosaic_0001>

<bundles_post_ra>
// kernel: tpu_custom_call.1
= control target key start
LH: loop header
LB: loop body
LE: loop exit
PB: predicated region body
PF: predicated region fallthrough
CT: control target
= control target key end

     0   :  { %13 = vsyncpa [#allocation4], 0  ;;  %s672_s0 = inlined_call_operand.hbm [shape: f32[8,24], index: 0, kind: input, shape index: {}]   ;;  %s673_s1 = inlined_call_operand.hbm [shape: f32[24,128], index: 1, kind: input, shape index: {}]   ;;  %s674_s2 = inlined_call_operand.vmem [shape: f32[1,128], index: 2, kind: input, shape index: {}]   ;;  %s675_s3 = inlined_call_operand.hbm [shape: f32[2,128,128], index: 3, kind: input, shape index: {}]   ;;  %s676_s4 = inlined_call_operand.vmem [shape: f32[2,1,128], index: 4, kind: input, shape index: {}]   ;;  %s677_s5 = inlined_call_operand.vmem [shape: f32[1,128], index: 5, kind: input, shape index: {}]   ;;  %s678_s6 = inlined_call_operand.<no memory space> [shape: f32[1], index: 6, kind: input, shape index: {}]   ;;  %s679_s7 = inlined_call_operand.vmem [shape: f32[8,1], index: 7, kind: output, shape index: {}]  }
   0x1   :  { %14 = vsyncpa [#allocation6], 0  ;;  %s557_s24 = smov [#allocation5]  }
   0x2   :  { %s30_s25 = sshll.u32 %s557_s24, 4  ;;  %s31_s25 = int_to_ptr.vmem [resolvable:$true] %s30_s25 }
   0x3   :  { %s501_s26 = scalar_lea.vmem %s31_s25, 384  ;;  %p506_p1 = scmp.lt.s32.totalorder %s31_s25, %s31_s25 }
   0x4   :  { %p502_p0 = scmp.ne.s32.totalorder %s31_s25, %s501_s26  ;;  %p507_p2 = scmp.lt.s32.totalorder %s501_s26, %s501_s26 }
   0x6   :  { %p508_p3 = por %p507_p2, %p506_p1 }
   0x8   :  { %p509_p4 = pnand %p508_p3, %p502_p0 }
   0xa   :  { %512 = shalt.err (!%p509_p4)
}
   0xb   :  { %s558_s27 = smov 128   ;;  %s559_s28 = smov 8  }
   0xc   :  { %36 = dma.hbm_to_vmem [thread:$0]  %s673_s1, 384, %s31_s25, [#allocation6], %s558_s27, %s558_s27, %s559_s28  }
   0xd   :  { %s560_s8 = smov [#allocation3]   ;;  %s561_s10 = smov [#allocation7]  }
   0xe   :  { %s21_s9 = sshll.u32 %s560_s8, 4  ;;  %s44_s11 = sshll.u32 %s561_s10, 4  ;;  %s22_s9 = int_to_ptr.vmem [resolvable:$true] %s21_s9  ;;  %s45_s11 = int_to_ptr.vmem [resolvable:$true] %s44_s11 }
   0xf   :  { %s521_s12 = scalar_lea.vmem %s22_s9, 128  ;;  %p526_p6 = scmp.lt.s32.totalorder %s22_s9, %s22_s9 }
  0x10   :  { %p522_p5 = scmp.ne.s32.totalorder %s22_s9, %s521_s12  ;;  %p527_p7 = scmp.lt.s32.totalorder %s521_s12, %s521_s12 }
  0x12   :  { %p528_p8 = por %p527_p7, %p526_p6 }
  0x14   :  { %p529_p9 = pnand %p528_p8, %p522_p5 }
  0x16   :  { %532 = shalt.err (!%p529_p9)
}
  0x17   :  { %24 = dma.hbm_to_vmem [thread:$0]  %s672_s0, 128, %s22_s9, [#allocation4]  }
  0x18   :  { %s541_s15 = scalar_lea.vmem %s45_s11, 4096  ;;  %p546_p11 = scmp.lt.s32.totalorder %s45_s11, %s45_s11 }
  0x19   :  { %p542_p10 = scmp.ne.s32.totalorder %s45_s11, %s541_s15  ;;  %p547_p12 = scmp.lt.s32.totalorder %s541_s15, %s541_s15 }
  0x1b   :  { %p548_p13 = por %p547_p12, %p546_p11 }
  0x1d   :  { %p549_p0 = pnand %p548_p13, %p542_p10 }
  0x1f   :  { %552 = shalt.err (!%p549_p0)
}
  0x20   :  { %50 = dma.hbm_to_vmem [thread:$0]  %s675_s3, 4096, %s45_s11, [#allocation6], %s558_s27, %s558_s27, %s559_s28  }
  0x21   :  { %553 = dma.done.wait [#allocation4], 128  }
  0x22   :  { %554 = vsyncadd [#allocation4], 4294967168 }
  0x23   :  { %555 = dma.done.wait [#allocation6], 4480  }
  0x24   :  { %556 = vsyncadd [#allocation6], 4294962816  ;;  %v562_v0 = vmov 0.0   ;;  %vm563_vm0 = vmmov 0   ;;  %v69_v1 = vld [vmem:[#allocation5 + $0x10] sm:$0xff]  ;;  %v68_v2 = vld [vmem:[#allocation5 + $0x8] sm:$0xff]  ;;  %v353_v54 = vstv %s678_s6 }
  0x25   :  { %407 = vmatprep.subr.mxu0 %v562_v0  ;;  %413 = vmatprep.mubr.msk.f32.mxu0 %vm563_vm0, %v562_v0  ;;  %v167_v3 = vld [vmem:[#allocation7 + $0x78] sm:$0xff]  ;;  %v166_v4 = vld [vmem:[#allocation7 + $0x70] sm:$0xff]  ;;  %v67_v5 = vld [vmem:[#allocation5] sm:$0xff]  ;;  %vm77_vm1 = vcmask 195584   ;;  %vm355_vm2 = vcmask 7168  }
  0x26   :  { %416 = vmatprep.subr.mxu1 %v562_v0  ;;  %448 = vmatprep.mubr.msk.f32.mxu1 %vm563_vm0, %v562_v0  ;;  %v66_v6 = vld [vmem:[#allocation3] sm:$0xff]  ;;  %v165_v7 = vld [vmem:[#allocation7 + $0x68] sm:$0xff]  ;;  %v163_v9 = vld [vmem:[#allocation7 + $0x58] sm:$0xff] }
  0x27   :  { %408 = vmatpush3.msra.mxu0 %v69_v1  ;;  %417 = vmatpush3.msra.mxu1 %v167_v3  ;;  %v164_v8 = vld [vmem:[#allocation7 + $0x60] sm:$0xff]  ;;  %v162_v10 = vld [vmem:[#allocation7 + $0x50] sm:$0xff]  ;;  %v161_v11 = vld [vmem:[#allocation7 + $0x48] sm:$0xff] }
  0x28   :  { %409 = vmatprep.subr.mxu0 %v562_v0  ;;  %418 = vmatprep.subr.mxu1 %v562_v0  ;;  %v160_v12 = vld [vmem:[#allocation7 + $0x40] sm:$0xff]  ;;  %v159_v13 = vld [vmem:[#allocation7 + $0x38] sm:$0xff]  ;;  %v158_v14 = vld [vmem:[#allocation7 + $0x30] sm:$0xff] }
  0x29   :  { %410 = vmatpush3.msra.mxu0 %v68_v2  ;;  %419 = vmatpush3.msra.mxu1 %v166_v4  ;;  %v157_v15 = vld [vmem:[#allocation7 + $0x28] sm:$0xff]  ;;  %v156_v16 = vld [vmem:[#allocation7 + $0x20] sm:$0xff]  ;;  %v155_v17 = vld [vmem:[#allocation7 + $0x18] sm:$0xff] }
  0x2a   :  { %411 = vmatprep.subr.mxu0 %v562_v0  ;;  %420 = vmatprep.subr.mxu1 %v562_v0  ;;  %v154_v18 = vld [vmem:[#allocation7 + $0x10] sm:$0xff]  ;;  %v153_v19 = vld [vmem:[#allocation7 + $0x8] sm:$0xff]  ;;  %v152_v20 = vld [vmem:[#allocation7] sm:$0xff] }
  0x2b   :  { %412 = vmatpush3.msra.mxu0 %v67_v5  ;;  %421 = vmatpush3.msra.mxu1 %v165_v7  ;;  %v262_v21 = vld [vmem:[#allocation7 + $0xf8] sm:$0xff]  ;;  %v261_v22 = vld [vmem:[#allocation7 + $0xf0] sm:$0xff]  ;;  %v260_v23 = vld [vmem:[#allocation7 + $0xe8] sm:$0xff] }
  0x2c   :  { %414 = vmatmul.mubr.msk.f32.vlgmr.msra.gmra.mxu0 %vm77_vm1, %v66_v6  ;;  %422 = vmatprep.subr.mxu1 %v562_v0  ;;  %v259_v24 = vld [vmem:[#allocation7 + $0xe0] sm:$0xff]  ;;  %v258_v25 = vld [vmem:[#allocation7 + $0xd8] sm:$0xff]  ;;  %v257_v26 = vld [vmem:[#allocation7 + $0xd0] sm:$0xff] }
  0x2d   :  { %451 = vmatprep.subr.mxu0 %v562_v0  ;;  %423 = vmatpush3.msra.mxu1 %v164_v8  ;;  %v256_v27 = vld [vmem:[#allocation7 + $0xc8] sm:$0xff]  ;;  %v255_v28 = vld [vmem:[#allocation7 + $0xc0] sm:$0xff]  ;;  %v254_v29 = vld [vmem:[#allocation7 + $0xb8] sm:$0xff] }
  0x2e   :  { %483 = vmatprep.mubr.msk.f32.mxu0 %vm563_vm0, %v562_v0  ;;  %424 = vmatprep.subr.mxu1 %v562_v0  ;;  %v253_v30 = vld [vmem:[#allocation7 + $0xb0] sm:$0xff]  ;;  %v252_v31 = vld [vmem:[#allocation7 + $0xa8] sm:$0xff]  ;;  %v251_v32 = vld [vmem:[#allocation7 + $0xa0] sm:$0xff] }
  0x2f   :  { %425 = vmatpush3.msra.mxu1 %v163_v9  ;;  %452 = vmatpush3.msra.mxu0 %v262_v21  ;;  %v250_v33 = vld [vmem:[#allocation7 + $0x98] sm:$0xff]  ;;  %v363_v34 = vld [vmem:[%s674_s2] ss:$0 sm:$0xff]  ;;  %v249_v39 = vld [vmem:[#allocation7 + $0x90] sm:$0xff] }
  0x30   :  { %426 = vmatprep.subr.mxu1 %v562_v0  ;;  %453 = vmatprep.subr.mxu0 %v562_v0  ;;  %v248_v40 = vld [vmem:[#allocation7 + $0x88] sm:$0xff]  ;;  %v247_v41 = vld [vmem:[#allocation7 + $0x80] sm:$0xff] }
  0x31   :  { %427 = vmatpush3.msra.mxu1 %v162_v10  ;;  %454 = vmatpush3.msra.mxu0 %v261_v22  ;;  %v365_v42 = vld [vmem:[%s676_s4] ss:$0 sm:$0xff]  ;;  %v367_v47 = vld [vmem:[%s676_s4 + $0x1] ss:$0 sm:$0xff] }
  0x32   :  { %428 = vmatprep.subr.mxu1 %v562_v0  ;;  %455 = vmatprep.subr.mxu0 %v562_v0  ;;  %v368_v51 = vld [vmem:[%s677_s5] ss:$0 sm:$0xff] }
  0x33   :  { %429 = vmatpush3.msra.mxu1 %v161_v11  ;;  %456 = vmatpush3.msra.mxu0 %v260_v23 }
  0x34   :  { %430 = vmatprep.subr.mxu1 %v562_v0  ;;  %457 = vmatprep.subr.mxu0 %v562_v0 }
  0x35   :  { %431 = vmatpush3.msra.mxu1 %v160_v12  ;;  %458 = vmatpush3.msra.mxu0 %v259_v24 }
  0x36   :  { %432 = vmatprep.subr.mxu1 %v562_v0  ;;  %459 = vmatprep.subr.mxu0 %v562_v0 }
  0x37   :  { %433 = vmatpush3.msra.mxu1 %v159_v13  ;;  %460 = vmatpush3.msra.mxu0 %v258_v25 }
  0x38   :  { %434 = vmatprep.subr.mxu1 %v562_v0  ;;  %461 = vmatprep.subr.mxu0 %v562_v0 }
  0x39   :  { %435 = vmatpush3.msra.mxu1 %v158_v14  ;;  %462 = vmatpush3.msra.mxu0 %v257_v26 }
  0x3a   :  { %436 = vmatprep.subr.mxu1 %v562_v0  ;;  %463 = vmatprep.subr.mxu0 %v562_v0 }
  0x3b   :  { %437 = vmatpush3.msra.mxu1 %v157_v15  ;;  %464 = vmatpush3.msra.mxu0 %v256_v27 }
  0x3c   :  { %438 = vmatprep.subr.mxu1 %v562_v0  ;;  %465 = vmatprep.subr.mxu0 %v562_v0 }
  0x3d   :  { %439 = vmatpush3.msra.mxu1 %v156_v16  ;;  %466 = vmatpush3.msra.mxu0 %v255_v28 }
  0x3e   :  { %440 = vmatprep.subr.mxu1 %v562_v0  ;;  %467 = vmatprep.subr.mxu0 %v562_v0 }
  0x3f   :  { %441 = vmatpush3.msra.mxu1 %v155_v17  ;;  %468 = vmatpush3.msra.mxu0 %v254_v29 }
  0x40   :  { %442 = vmatprep.subr.mxu1 %v562_v0  ;;  %469 = vmatprep.subr.mxu0 %v562_v0 }
  0x41   :  { %443 = vmatpush3.msra.mxu1 %v154_v18  ;;  %470 = vmatpush3.msra.mxu0 %v253_v30 }
  0x42   :  { %444 = vmatprep.subr.mxu1 %v562_v0  ;;  %471 = vmatprep.subr.mxu0 %v562_v0 }
  0x43   :  { %445 = vmatpush3.msra.mxu1 %v153_v19  ;;  %472 = vmatpush3.msra.mxu0 %v252_v31 }
  0x44   :  { %446 = vmatprep.subr.mxu1 %v562_v0  ;;  %473 = vmatprep.subr.mxu0 %v562_v0 }
  0x45   :  { %447 = vmatpush3.msra.mxu1 %v152_v20  ;;  %474 = vmatpush3.msra.mxu0 %v251_v32 }
  0x46   :  { %475 = vmatprep.subr.mxu0 %v562_v0 }
  0x47   :  { %476 = vmatpush3.msra.mxu0 %v250_v33 }
  0x48   :  { %477 = vmatprep.subr.mxu0 %v562_v0 }
  0x49   :  { %478 = vmatpush3.msra.mxu0 %v249_v39 }
  0x4a   :  { %479 = vmatprep.subr.mxu0 %v562_v0 }
  0x4b   :  { %480 = vmatpush3.msra.mxu0 %v248_v40 }
  0x4c   :  { %481 = vmatprep.subr.mxu0 %v562_v0 }
  0x4d   :  { %482 = vmatpush3.msra.mxu0 %v247_v41 }
  0xec   :  { %v147_v35 = vpop.f32.mrf.mxu0 }
  0xed   :  { %v148_v36 = vadd.f32 %v363_v34, %v147_v35 }
  0xee   :  { %v415_v37 = vpop.f32.mrf.mxu0 }
  0xef   :  { %v151_v38 = vmax.f32 %v148_v36, 0.0 }
  0xf1   :  { %449 = vmatmul.mubr.f32.vlgmr.msra.gmra.mxu1 %v151_v38 }
 0x1b1   :  { %v241_v43 = vpop.f32.mrf.mxu1 }
 0x1b2   :  { %v242_v44 = vadd.f32 %v365_v42, %v241_v43 }
 0x1b3   :  { %v450_v45 = vpop.f32.mrf.mxu1 }
 0x1b4   :  { %v245_v46 = vmax.f32 %v242_v44, 0.0 }
 0x1b6   :  { %484 = vmatmul.mubr.f32.vlgmr.msra.gmra.mxu0 %v245_v46 }
 0x276   :  { %v337_v48 = vpop.f32.mrf.mxu0 }
 0x277   :  { %v338_v49 = vadd.f32 %v367_v47, %v337_v48 }
 0x278   :  { %v485_v50 = vpop.f32.mrf.mxu0 }
 0x279   :  { %v341_v52 = vmax.f32 %v338_v49, 0.0 }
 0x27b   :  { %v349_v53 = vmul.f32 %v368_v51, %v341_v52 }
 0x27d   :  { %350 = vadd.xlane.f32.xlu0 %v349_v53 }
 0x306   :  { %v351_v55 = vpop.xlane.xlu0 %350 }
 0x307   :  { %v354_v56 = vadd.f32 %v353_v54, %v351_v55 }
 0x309   :  { %356 = vst.msk [vmem:[%s679_s7] sm:$0xff] %vm355_vm2, %v354_v56 }
 0x30a   :  { %361 = vsyncpa [#allocation4], 1 }
 0x30b   :  { %362 = vsyncpa [#allocation6], 1 }

</bundles_post_ra>
